<compile_context>
chip_gen: v6e
topology: v6e:2x2x1
jax: 0.10.0
libtpu: 0.0.40
codegen_flags: <defaults>
</compile_context>

<pallas_src>
import jax
import jax.numpy as jnp
from jax.experimental import pallas as pl
from jax.experimental.pallas import tpu as pltpu

LANE = 128


def _round_up(n, m):
    return ((n + m - 1) // m) * m


def _vmem_capacity_bytes():
    """Physical VMEM of the local TPU generation (conservative fallback)."""
    try:
        info = pltpu.get_tpu_info()
        cap = getattr(info, "vmem_capacity_bytes", None)
        if cap:
            return int(cap)
    except Exception:
        pass
    return 64 << 20  # assume the smallest-VMEM generation (v7x)


def propagate_kernel(xk_ref, xw_ref, adjT_ref, score_ref, acc_ref):
    """score[j-tile] = sigmoid(x*nw + sum_k x[k-tile] @ adjT[k-tile, j-tile])."""
    k = pl.program_id(1)

    @pl.when(k == 0)
    def _():
        acc_ref[...] = jnp.zeros_like(acc_ref)

    # adjT holds exact small integer edge counts, so the bf16 -> f32 upcast of
    # the (tile_k, tile_n) block is exact; the f32 temp is tile-bounded
    # (independent of N) and included in the VMEM budget in the wrapper.
    acc_ref[...] += jnp.dot(xk_ref[...], adjT_ref[...].astype(jnp.float32),
                            preferred_element_type=jnp.float32)

    @pl.when(k == pl.num_programs(1) - 1)
    def _():
        score_ref[...] = jax.nn.sigmoid(xw_ref[...] + acc_ref[...])


def pagerank_forward(x, node_weight, edge_index, home, away):
    """x, node_weight: (N, 1) f32; edge_index: (2, E) int32; home/away: (G,) int32."""
    N = x.shape[0]
    G = home.shape[0]
    src, dst = edge_index[0], edge_index[1]

    # ---- generation-aware tiling -------------------------------------------
    vmem_cap = _vmem_capacity_bytes()
    # Explicit scoped-VMEM request (v5e's scoped default is only 16 MiB).
    vmem_limit = int(min(96 << 20, max(32 << 20, int(vmem_cap * 0.6))))
    # Dominant VMEM use per grid step:
    #   2 * tile_k * tile_n * 2B   (double-buffered bf16 adjT block)
    # +     tile_k * tile_n * 4B   (in-kernel f32 upcast temp)
    # -> ~2 MiB at tile 512, ~8 MiB at tile 1024: well under vmem_limit on
    # every generation; keep the smaller tile only on v7x (64 MiB VMEM).
    tile_cap = 512 if vmem_cap < (100 << 20) else 1024

    Pn = _round_up(max(N, LANE), LANE)
    tile_n = min(Pn, tile_cap)
    # Ensure the "parallel" lane axis has >= 2 stripes when possible so v7x's
    # two TensorCores both get work (no-op on 1-TC gens / tiny graphs).
    if Pn > LANE and Pn // tile_n < 2:
        tile_n = max(LANE, _round_up(Pn // 2, LANE))
    Pn = _round_up(Pn, tile_n)
    n_tiles = Pn // tile_n

    tile_k = min(_round_up(max(N, LANE), LANE), tile_cap)
    Pk = _round_up(max(N, LANE), tile_k)
    k_tiles = Pk // tile_k

    # ---- glue (plain JAX): lane-major rows + dense bf16 transposed adjacency
    xf = x.reshape(-1).astype(jnp.float32)
    nwf = node_weight.reshape(-1).astype(jnp.float32)
    xk_row = jnp.zeros((1, Pk), jnp.float32).at[0, :N].set(xf)
    # data.x * node_weight folded into a single bias row (removes one stream).
    xw_row = jnp.zeros((1, Pn), jnp.float32).at[0, :N].set(xf * nwf)
    # adjT[src, dst] = multiplicity of edge src->dst, built directly in bf16
    # (exact for counts <= 256): no f32 dense write + cast round trip.
    adjT = jnp.zeros((Pk, Pn), jnp.bfloat16).at[src, dst].add(
        jnp.ones_like(src, dtype=jnp.bfloat16))
    # TODO(synk): for production graph sizes replace the dense O(N^2) adjacency
    # with a sparse scatter-add over edge_index (scalar-prefetched CSR blocks).

    score = pl.pallas_call(
        propagate_kernel,
        out_shape=jax.ShapeDtypeStruct((1, Pn), jnp.float32),
        grid_spec=pltpu.PrefetchScalarGridSpec(
            num_scalar_prefetch=0,
            grid=(n_tiles, k_tiles),                                  # K last
            in_specs=[
                pl.BlockSpec((1, tile_k), lambda j, k: (0, k)),       # x (contraction)
                pl.BlockSpec((1, tile_n), lambda j, k: (0, j)),       # x * node_weight
                pl.BlockSpec((tile_k, tile_n), lambda j, k: (k, j)),  # adjT block
            ],
            out_specs=pl.BlockSpec((1, tile_n), lambda j, k: (0, j)),
            scratch_shapes=[pltpu.VMEM((1, tile_n), jnp.float32)],
        ),
        compiler_params=pltpu.CompilerParams(
            dimension_semantics=("parallel", "arbitrary"),
            vmem_limit_bytes=vmem_limit,
        ),
        cost_estimate=pl.CostEstimate(
            flops=2 * Pk * Pn,
            transcendentals=Pn,
            bytes_accessed=Pk * Pn * 2 + (Pk + 3 * Pn) * 4,
        ),
    )(xk_row, xw_row, adjT)

    new_x = score[0, :N].reshape(N, 1)
    # G-scalar gather + sign: a plain-JAX gather is cheaper than a second
    # kernel launch + HBM round trip of the score row.
    pred = jnp.sign(score[0, home] - score[0, away]).reshape(G, 1)
    return pred, new_x


def pagerank_reference(x, node_weight, edge_index, home, away):
    """Pure-JAX reference of the PyTorch forward (training=True)."""
    src, dst = edge_index[0], edge_index[1]
    agg = jnp.zeros_like(x).at[dst].add(x[src])          # GCNConv aggregation
    s = jax.nn.sigmoid(x * node_weight + agg)            # updated data.x
    return jnp.sign(s[home] - s[away]), s


if __name__ == "__main__":
    key = jax.random.PRNGKey(0)
    N, E, G = 16, 40, 4
    k1, k2, k3, k4, k5, k6 = jax.random.split(key, 6)

    # data.x and data.node_weight as (N, 1) so the in-place torch broadcasting
    # in the module is well defined.
    x = jax.random.normal(k1, (N, 1), dtype=jnp.float32)
    node_weight = jax.random.normal(k2, (N, 1), dtype=jnp.float32)

    src = jax.random.randint(k3, (E,), 0, N, dtype=jnp.int32)
    dst = jax.random.randint(k4, (E,), 0, N, dtype=jnp.int32)
    edge_index = jnp.stack([src, dst], axis=0)            # (2, E)

    home = jax.random.randint(k5, (G,), 0, N, dtype=jnp.int32)
    away = (home + 1 + jax.random.randint(k6, (G,), 0, N - 1,
                                          dtype=jnp.int32)) % N

    pred, new_x = pagerank_forward(x, node_weight, edge_index, home, away)
    jax.block_until_ready((pred, new_x))

    ref_pred, ref_x = pagerank_reference(x, node_weight, edge_index, home, away)
    assert jnp.allclose(new_x, ref_x, atol=1e-5), "updated node scores mismatch"
    assert jnp.array_equal(pred, ref_pred), "sign(home - away) mismatch"

    print("KERNEL_OK")
</pallas_src>

<mosaic_0001>
module attributes {stable_mosaic.version = 11 : i64} {
  func.func @propagate_kernel(%arg0: i32, %arg1: i32, %arg2: memref<1x128xf32, #tpu.memory_space<vmem>>, %arg3: memref<1x128xf32, #tpu.memory_space<vmem>>, %arg4: memref<128x128xbf16, #tpu.memory_space<vmem>>, %arg5: memref<1x128xf32, #tpu.memory_space<vmem>>, %arg6: memref<1x128xf32, #tpu.memory_space<vmem>>) attributes {dimension_semantics = [#tpu.dimension_semantics<parallel>, #tpu.dimension_semantics<arbitrary>], iteration_bounds = array<i64: 1, 1>, scalar_prefetch = 0 : i64, scratch_operands = 1 : i64, tpu.core_type = #tpu.core_type<tc>, window_params = [{transform_indices = @transform_0, window_bounds = array<i64: 1, 128>}, {transform_indices = @transform_1, window_bounds = array<i64: 1, 128>}, {transform_indices = @transform_2, window_bounds = array<i64: 128, 128>}, {transform_indices = @transform_3, window_bounds = array<i64: 1, 128>}]} {
    %c0_i32 = arith.constant 0 : i32
    %0 = arith.cmpi eq, %arg1, %c0_i32 : i32
    %1 = arith.extui %0 : i1 to i32
    %c0_i32_0 = arith.constant 0 : i32
    %2 = arith.cmpi ne, %1, %c0_i32_0 : i32
    scf.if %2 {
      %cst_10 = arith.constant 0.000000e+00 : f32
      %13 = vector.broadcast %cst_10 : f32 to vector<1x128xf32>
      %c0_11 = arith.constant 0 : index
      %c0_12 = arith.constant 0 : index
      %14 = vector.load %arg6[%c0_11, %c0_12] : memref<1x128xf32, #tpu.memory_space<vmem>>, vector<1x128xf32>
      tpu.vector_store %arg6[%c0_11, %c0_12], %13 {strides = array<i32>} : memref<1x128xf32, #tpu.memory_space<vmem>>, vector<1x128xf32>,
    } else {
    }
    %c0 = arith.constant 0 : index
    %c0_1 = arith.constant 0 : index
    %3 = vector.load %arg6[%c0, %c0_1] : memref<1x128xf32, #tpu.memory_space<vmem>>, vector<1x128xf32>
    %c0_2 = arith.constant 0 : index
    %c0_3 = arith.constant 0 : index
    %4 = vector.load %arg2[%c0_2, %c0_3] : memref<1x128xf32, #tpu.memory_space<vmem>>, vector<1x128xf32>
    %c0_4 = arith.constant 0 : index
    %c0_5 = arith.constant 0 : index
    %5 = vector.load %arg4[%c0_4, %c0_5] : memref<128x128xbf16, #tpu.memory_space<vmem>>, vector<128x128xbf16>
    %6 = arith.extf %5 : vector<128x128xbf16> to vector<128x128xf32>
    %cst = arith.constant dense<0.000000e+00> : vector<1x128xf32>
    %7 = tpu.matmul %4, %6, %cst {dimension_numbers = #tpu.dot_dimension_numbers<[1], [0], [0], [1], [0, 0, 1, 1], [], []>} : vector<1x128xf32>, vector<128x128xf32>, vector<1x128xf32> -> vector<1x128xf32>
    %8 = arith.addf %3, %7 : vector<1x128xf32>
    %c0_6 = arith.constant 0 : index
    %c0_7 = arith.constant 0 : index
    %9 = vector.load %arg6[%c0_6, %c0_7] : memref<1x128xf32, #tpu.memory_space<vmem>>, vector<1x128xf32>
    tpu.vector_store %arg6[%c0_6, %c0_7], %8 {strides = array<i32>} : memref<1x128xf32, #tpu.memory_space<vmem>>, vector<1x128xf32>,
    %c0_i32_8 = arith.constant 0 : i32
    %10 = arith.cmpi eq, %arg1, %c0_i32_8 : i32
    %11 = arith.extui %10 : i1 to i32
    %c0_i32_9 = arith.constant 0 : i32
    %12 = arith.cmpi ne, %11, %c0_i32_9 : i32
    scf.if %12 {
      %c0_10 = arith.constant 0 : index
      %c0_11 = arith.constant 0 : index
      %13 = vector.load %arg3[%c0_10, %c0_11] : memref<1x128xf32, #tpu.memory_space<vmem>>, vector<1x128xf32>
      %c0_12 = arith.constant 0 : index
      %c0_13 = arith.constant 0 : index
      %14 = vector.load %arg6[%c0_12, %c0_13] : memref<1x128xf32, #tpu.memory_space<vmem>>, vector<1x128xf32>
      %15 = arith.addf %13, %14 : vector<1x128xf32>
      %16 = arith.negf %15 : vector<1x128xf32>
      %17 = math.exp %16 : vector<1x128xf32>
      %cst_14 = arith.constant 1.000000e+00 : f32
      %18 = vector.broadcast %cst_14 : f32 to vector<1x128xf32>
      %19 = arith.addf %18, %17 : vector<1x128xf32>
      %20 = arith.divf %18, %19 : vector<1x128xf32>
      %c0_15 = arith.constant 0 : index
      %c0_16 = arith.constant 0 : index
      %21 = vector.load %arg5[%c0_15, %c0_16] : memref<1x128xf32, #tpu.memory_space<vmem>>, vector<1x128xf32>
      tpu.vector_store %arg5[%c0_15, %c0_16], %20 {strides = array<i32>} : memref<1x128xf32, #tpu.memory_space<vmem>>, vector<1x128xf32>,
    } else {
    }
    return
  }
  func.func @transform_0(%arg0: i32, %arg1: i32) -> (i32, i32) {
    %c0_i32 = arith.constant 0 : i32
    %c0_i32_0 = arith.constant 0 : i32
    return %c0_i32, %arg1 : i32, i32
  }
  func.func @transform_1(%arg0: i32, %arg1: i32) -> (i32, i32) {
    %c0_i32 = arith.constant 0 : i32
    %c0_i32_0 = arith.constant 0 : i32
    return %c0_i32, %arg0 : i32, i32
  }
  func.func @transform_2(%arg0: i32, %arg1: i32) -> (i32, i32) {
    %c0_i32 = arith.constant 0 : i32
    return %arg1, %arg0 : i32, i32
  }
  func.func @transform_3(%arg0: i32, %arg1: i32) -> (i32, i32) {
    %c0_i32 = arith.constant 0 : i32
    %c0_i32_0 = arith.constant 0 : i32
    return %c0_i32, %arg0 : i32, i32
  }
}

</mosaic_0001>

<bundles_post_ra>
// kernel: tpu_custom_call.1
= control target key start
LH: loop header
LB: loop body
LE: loop exit
PB: predicated region body
PF: predicated region fallthrough
CT: control target
= control target key end

     0   :  { %8 = vsyncpa [#allocation4], 0  ;;  %s389_s0 = inlined_call_operand.hbm [shape: f32[1,128], index: 0, kind: input, shape index: {}]   ;;  %s390_s1 = inlined_call_operand.vmem [shape: f32[1,128], index: 1, kind: input, shape index: {}]   ;;  %s391_s2 = inlined_call_operand.hbm [shape: bf16[128,128], index: 2, kind: input, shape index: {}]   ;;  %s392_s3 = inlined_call_operand.hbm [shape: f32[1,128], index: 3, kind: output, shape index: {}]  }
   0x1   :  { %9 = vsyncpa [#allocation7], 0 }
   0x2   :  { %10 = vsyncpa [#allocation5], 0  ;;  %s350_s12 = smov [#allocation3]   ;;  %s351_s14 = smov [#allocation6]  }
   0x3   :  { %s17_s13 = sshll.u32 %s350_s12, 4  ;;  %s28_s15 = sshll.u32 %s351_s14, 4  ;;  %s18_s13 = int_to_ptr.vmem [resolvable:$true] %s17_s13  ;;  %s29_s15 = int_to_ptr.vmem [resolvable:$true] %s28_s15 }
   0x4   :  { %s292_s16 = scalar_lea.vmem %s18_s13, 16  ;;  %s296_s17 = scalar_lea.vmem %s18_s13, 32 }
   0x5   :  { %p293_p0 = scmp.ne.s32.totalorder %s18_s13, %s292_s16  ;;  %p297_p1 = scmp.lt.s32.totalorder %s18_s13, %s18_s13 }
   0x6   :  { %p298_p2 = scmp.lt.s32.totalorder %s296_s17, %s292_s16 }
   0x8   :  { %p299_p3 = por %p298_p2, %p297_p1 }
   0xa   :  { %p300_p4 = pnand %p299_p3, %p293_p0 }
   0xc   :  { %303 = shalt.err (!%p300_p4)
}
   0xd   :  { %20 = dma.hbm_to_vmem [thread:$0]  %s389_s0, 16, %s18_s13, [#allocation4]  }
   0xe   :  { %s312_s20 = scalar_lea.vmem %s29_s15, 1024  ;;  %p317_p6 = scmp.lt.s32.totalorder %s29_s15, %s29_s15 }
   0xf   :  { %p313_p5 = scmp.ne.s32.totalorder %s29_s15, %s312_s20  ;;  %p318_p7 = scmp.lt.s32.totalorder %s312_s20, %s312_s20 }
  0x11   :  { %p319_p8 = por %p318_p7, %p317_p6 }
  0x13   :  { %p320_p9 = pnand %p319_p8, %p313_p5 }
  0x15   :  { %323 = shalt.err (!%p320_p9)
}
  0x16   :  { %s352_s21 = smov 64   ;;  %s353_s22 = smov 4  }
  0x17   :  { %34 = dma.hbm_to_vmem [thread:$0]  %s391_s2, 1024, %s29_s15, [#allocation7], %s352_s21, %s352_s21, %s353_s22  }
  0x18   :  { %344 = dma.done.wait [#allocation4], 16  }
  0x19   :  { %345 = vsyncadd [#allocation4], 4294967280 }
  0x1a   :  { %346 = dma.done.wait [#allocation7], 1024  }
  0x1b   :  { %347 = vsyncadd [#allocation7], 4294966272  ;;  %v354_v0 = vmov 0.0   ;;  %vm355_vm0 = vmmov 0   ;;  %v220_v1 = vld [vmem:[#allocation6 + $0x38] sm:$0xff]   ;;  %v219_v2 = vld [vmem:[#allocation6 + $0x30] sm:$0xff]  }
  0x1c   :  { %238 = vmatprep.subr.mxu0 %v354_v0  ;;  %45 = vst [vmem:[#allocation2] sm:$0x1] %v354_v0  ;;  %270 = vmatprep.mubr.msk.f32.mxu0 %vm355_vm0, %v354_v0  ;;  %v212_v3 = vunpack.c.l.bf16 %v220_v1  ;;  %v213_v4 = vunpack.c.h.bf16 %v220_v1  ;;  %v209_v5 = vunpack.c.h.bf16 %v219_v2  ;;  %v218_v6 = vld [vmem:[#allocation6 + $0x28] sm:$0xff]   ;;  %v208_v7 = vunpack.c.l.bf16 %v219_v2  ;;  %v217_v9 = vld [vmem:[#allocation6 + $0x20] sm:$0xff]   ;;  %v216_v12 = vld [vmem:[#allocation6 + $0x18] sm:$0xff]   ;;  %s356_s25 = smov [#allocation8]  }
  0x1d   :  { %v205_v8 = vunpack.c.h.bf16 %v218_v6  ;;  %v204_v10 = vunpack.c.l.bf16 %v218_v6  ;;  %v201_v11 = vunpack.c.h.bf16 %v217_v9  ;;  %v200_v13 = vunpack.c.l.bf16 %v217_v9  ;;  %v215_v15 = vld [vmem:[#allocation6 + $0x10] sm:$0xff]   ;;  %v214_v18 = vld [vmem:[#allocation6 + $0x8] sm:$0xff]   ;;  %v183_v21 = vld [vmem:[#allocation6] sm:$0xff]   ;;  %s171_s26 = sshll.u32 %s356_s25, 4  ;;  %s172_s26 = int_to_ptr.vmem [resolvable:$true] %s171_s26 }
  0x1e   :  { %239 = vmatpush3.msra.mxu0 %v213_v4  ;;  %v197_v14 = vunpack.c.h.bf16 %v216_v12  ;;  %v196_v16 = vunpack.c.l.bf16 %v216_v12  ;;  %v193_v17 = vunpack.c.h.bf16 %v215_v15  ;;  %v192_v19 = vunpack.c.l.bf16 %v215_v15  ;;  %v47_v25 = vld [vmem:[#allocation3] sm:$0x1]  ;;  %v155_v30 = vld [vmem:[%s390_s1] sm:$0x1]  ;;  %s324_s27 = scalar_lea.vmem %s172_s26, 16  ;;  %s328_s28 = scalar_lea.vmem %s172_s26, 32 }
  0x1f   :  { %240 = vmatprep.subr.mxu0 %v354_v0  ;;  %v189_v20 = vunpack.c.h.bf16 %v214_v18  ;;  %v188_v22 = vunpack.c.l.bf16 %v214_v18  ;;  %v185_v23 = vunpack.c.h.bf16 %v183_v21  ;;  %v184_v24 = vunpack.c.l.bf16 %v183_v21  ;;  %p325_p10 = scmp.ne.s32.totalorder %s172_s26, %s324_s27  ;;  %p329_p11 = scmp.lt.s32.totalorder %s172_s26, %s172_s26 }
  0x20   :  { %241 = vmatpush3.msra.mxu0 %v212_v3  ;;  %p330_p12 = scmp.lt.s32.totalorder %s328_s28, %s324_s27 }
  0x21   :  { %242 = vmatprep.subr.mxu0 %v354_v0 }
  0x22   :  { %243 = vmatpush3.msra.mxu0 %v209_v5  ;;  %p331_p13 = por %p330_p12, %p329_p11 }
  0x23   :  { %244 = vmatprep.subr.mxu0 %v354_v0  ;;  %v46_v26 = vld [vmem:[#allocation2] sm:$0x1] }
  0x24   :  { %245 = vmatpush3.msra.mxu0 %v208_v7  ;;  %p332_p0 = pnand %p331_p13, %p325_p10 }
  0x25   :  { %246 = vmatprep.subr.mxu0 %v354_v0 }
  0x26   :  { %247 = vmatpush3.msra.mxu0 %v205_v8 }
  0x27   :  { %248 = vmatprep.subr.mxu0 %v354_v0 }
  0x28   :  { %249 = vmatpush3.msra.mxu0 %v204_v10 }
  0x29   :  { %250 = vmatprep.subr.mxu0 %v354_v0 }
  0x2a   :  { %251 = vmatpush3.msra.mxu0 %v201_v11 }
  0x2b   :  { %252 = vmatprep.subr.mxu0 %v354_v0 }
  0x2c   :  { %253 = vmatpush3.msra.mxu0 %v200_v13 }
  0x2d   :  { %254 = vmatprep.subr.mxu0 %v354_v0 }
  0x2e   :  { %255 = vmatpush3.msra.mxu0 %v197_v14 }
  0x2f   :  { %256 = vmatprep.subr.mxu0 %v354_v0 }
  0x30   :  { %257 = vmatpush3.msra.mxu0 %v196_v16 }
  0x31   :  { %258 = vmatprep.subr.mxu0 %v354_v0 }
  0x32   :  { %259 = vmatpush3.msra.mxu0 %v193_v17 }
  0x33   :  { %260 = vmatprep.subr.mxu0 %v354_v0 }
  0x34   :  { %261 = vmatpush3.msra.mxu0 %v192_v19 }
  0x35   :  { %262 = vmatprep.subr.mxu0 %v354_v0 }
  0x36   :  { %263 = vmatpush3.msra.mxu0 %v189_v20 }
  0x37   :  { %264 = vmatprep.subr.mxu0 %v354_v0 }
  0x38   :  { %265 = vmatpush3.msra.mxu0 %v188_v22 }
  0x39   :  { %266 = vmatprep.subr.mxu0 %v354_v0 }
  0x3a   :  { %267 = vmatpush3.msra.mxu0 %v185_v23 }
  0x3b   :  { %268 = vmatprep.subr.mxu0 %v354_v0 }
  0x3c   :  { %269 = vmatpush3.msra.mxu0 %v184_v24 }
  0x3d   :  { %271 = vmatmul.mubr.f32.vlgmr.msra.gmra.mxu0 %v47_v25 }
  0xfd   :  { %v146_v27 = vpop.f32.mrf.mxu0 }
  0xfe   :  { %v150_v28 = vadd.f32 %v146_v27, %v46_v26 }
  0xff   :  { %v272_v29 = vpop.f32.mrf.mxu0 }
 0x100   :  { %151 = vst [vmem:[#allocation2] sm:$0x1] %v150_v28 }
 0x107   :  { %v156_v31 = vld [vmem:[#allocation2] sm:$0x1] }
 0x108   :  { %v157_v32 = vadd.f32 %v156_v31, %v155_v30 }
 0x10a   :  { %v181_v33 = vmul.f32 -1.442695, %v157_v32 }
 0x10c   :  { %280 = vpow2.f32 %v181_v33 }
 0x119   :  { %v281_v34 = vpop.eup %280 }
 0x11a   :  { %v161_v35 = vadd.f32 1.0, %v281_v34 }
 0x11c   :  { %282 = vrcp.f32 %v161_v35 }
 0x129   :  { %v283_v36 = vpop.eup %282 }
 0x12a   :  { %164 = vst [vmem:[#allocation8] sm:$0x1] %v283_v36 }
 0x12b   :  { %335 = shalt.err (!%p332_p0)
}
 0x12c   :  { %174 = dma.vmem_to_hbm [thread:$0]  %s172_s26, 16, %s392_s3, [#allocation5]  }
 0x12d   :  { %348 = dma.done.wait [#allocation5], 16  }
 0x12e   :  { %349 = vsyncadd [#allocation5], 4294967280 }
 0x12f   :  { %178 = vsyncpa [#allocation4], 1 }
 0x130   :  { %179 = vsyncpa [#allocation7], 1 }
 0x131   :  { %180 = vsyncpa [#allocation5], 1 }

</bundles_post_ra>
